<compile_context>
chip_gen: v6e
topology: v6e:2x2x1
jax: 0.10.0
libtpu: 0.0.40
codegen_flags: <defaults>
</compile_context>

<pallas_src>
import functools

import jax
import jax.numpy as jnp
import numpy as np
from jax import lax
from jax.experimental import pallas as pl
from jax.experimental.pallas import tpu as pltpu


def _relu_dot(pre, e, mxu_dtype):
    # (E, D) @ (D, TB) on the MXU with bf16 operands + f32 accumulation,
    # then VPU relu in f32.
    return jnp.maximum(
        jnp.dot(pre.astype(mxu_dtype), e.astype(mxu_dtype),
                preferred_element_type=jnp.float32),
        0.0,
    )


def _set_intersection_kernel2(pre_ref, post_ref, e1_ref, e2_ref, o_ref, *,
                              mxu_dtype):
    # TODO(synk): the per-tile dots share the same small (E, D) stationary
    # operand; pltpu.matmul_push_rhs/matmul_acc_lhs/matmul_pop (or a lane-axis
    # concat) could remove the repeated MXU fill/drain, but the kernel is
    # HBM-bound at these shapes and the concat adds a VMEM store (hurts v5e).
    pre = pre_ref[...]
    combined = jnp.minimum(_relu_dot(pre, e1_ref[...], mxu_dtype),
                           _relu_dot(pre, e2_ref[...], mxu_dtype))
    o_ref[...] = jnp.dot(post_ref[...].astype(mxu_dtype),
                         combined.astype(mxu_dtype),
                         preferred_element_type=jnp.float32
                         ).astype(o_ref.dtype)


def _set_intersection_kernel3(pre_ref, post_ref, e1_ref, e2_ref, e3_ref, o_ref,
                              *, mxu_dtype):
    pre = pre_ref[...]
    combined = jnp.minimum(
        jnp.minimum(_relu_dot(pre, e1_ref[...], mxu_dtype),
                    _relu_dot(pre, e2_ref[...], mxu_dtype)),
        _relu_dot(pre, e3_ref[...], mxu_dtype),
    )
    o_ref[...] = jnp.dot(post_ref[...].astype(mxu_dtype),
                         combined.astype(mxu_dtype),
                         preferred_element_type=jnp.float32
                         ).astype(o_ref.dtype)


def _round_up(x, m):
    return ((x + m - 1) // m) * m


def _is_v7x():
    # Only v7x has 2 TensorCores per chip; plain "parallel" is a near no-op
    # there, so we opt into CORE_PARALLEL on that generation only.
    try:
        kind = jax.devices()[0].device_kind.lower()
    except Exception:
        return False
    return "v7" in kind or "7x" in kind


def _xla_forward(pre, post, embeds):
    # Plain-XLA reference / small-batch fallback (f32, HIGHEST precision).
    hp = lax.Precision.HIGHEST
    combined = jax.nn.relu(jnp.dot(pre, embeds[0], precision=hp))
    for e in embeds[1:]:
        combined = jnp.minimum(combined,
                               jax.nn.relu(jnp.dot(pre, e, precision=hp)))
    return jnp.dot(post, combined, precision=hp)


def set_intersection(pre_mat, post_mat, embeds1, embeds2, embeds3=None, *,
                     tile_batch=2048, min_pallas_batch=128,
                     mxu_dtype=jnp.bfloat16):
    """min-aggregated SetIntersection forward.

    pre_mat: (E, D) f32; post_mat: (D, E) f32; embeds*: (D, B) f32.
    Returns (D, B) f32.
    """
    E, D = pre_mat.shape
    assert post_mat.shape == (D, E), "post_mat must be (mode_dim, expand_dim)"

    embeds = [jnp.asarray(embeds1), jnp.asarray(embeds2)]
    if embeds3 is not None and not (
        isinstance(embeds3, (list, tuple)) and len(embeds3) == 0
    ):
        embeds.append(jnp.asarray(embeds3))

    d_in, batch = embeds[0].shape
    assert d_in == D, "embeddings must be (mode_dim, batch)"

    if batch < min_pallas_batch:
        # Launch / fixed-cost dominated at this size; plain XLA is cheaper.
        return _xla_forward(pre_mat, post_mat, embeds)

    # Lane-dense batch tile (multiple of 128).  No wrapper pad/slice: grid is
    # cdiv(batch, tb) and Pallas masks the partial edge tile.
    tb = min(tile_batch, _round_up(batch, 128))
    tb = max(128, (tb // 128) * 128)

    core_parallel = _is_v7x()
    if core_parallel:
        # Both v7x TensorCores only get work if there are >= 2 batch tiles.
        while pl.cdiv(batch, tb) < 2 and tb > 128:
            tb = max(128, _round_up(tb // 2, 128))

    grid = (pl.cdiv(batch, tb),)

    pre_spec = pl.BlockSpec((E, D), lambda b: (0, 0))    # VMEM-resident
    post_spec = pl.BlockSpec((D, E), lambda b: (0, 0))   # VMEM-resident
    emb_spec = pl.BlockSpec((D, tb), lambda b: (0, b))
    out_spec = pl.BlockSpec((D, tb), lambda b: (0, b))

    if len(embeds) == 2:
        kernel = functools.partial(_set_intersection_kernel2,
                                   mxu_dtype=mxu_dtype)
    else:
        kernel = functools.partial(_set_intersection_kernel3,
                                   mxu_dtype=mxu_dtype)

    semantics = (pltpu.CORE_PARALLEL,) if core_parallel else (pltpu.PARALLEL,)

    return pl.pallas_call(
        kernel,
        out_shape=jax.ShapeDtypeStruct((D, batch), jnp.float32),
        grid=grid,
        in_specs=[pre_spec, post_spec] + [emb_spec] * len(embeds),
        out_specs=out_spec,
        compiler_params=pltpu.CompilerParams(dimension_semantics=semantics),
    )(pre_mat, post_mat, *embeds)


class SetIntersectionJAX:
    """JAX port of netquery SetIntersection (agg_func = elementwise min)."""

    def __init__(self, mode_dims, expand_dims, key):
        self.pre_mats = {}
        self.post_mats = {}
        for mode in mode_dims:
            d, e = mode_dims[mode], expand_dims[mode]
            key, k_pre, k_post = jax.random.split(key, 3)
            bound = float(np.sqrt(6.0 / (d + e)))  # xavier_uniform_
            self.pre_mats[mode] = jax.random.uniform(
                k_pre, (e, d), jnp.float32, minval=-bound, maxval=bound)
            self.post_mats[mode] = jax.random.uniform(
                k_post, (d, e), jnp.float32, minval=-bound, maxval=bound)

    def forward(self, embeds1, embeds2, mode, embeds3=None, **kwargs):
        # TODO(synk): only the default agg_func=torch.min is implemented (e.g.
        # torch.mean would need a trivial kernel variant).  Batching several
        # modes into one pallas_call via PrefetchScalarGridSpec (scalar-
        # prefetched mode index selecting pre/post) is left for a future rev.
        return set_intersection(self.pre_mats[mode], self.post_mats[mode],
                                embeds1, embeds2, embeds3, **kwargs)

    def forward_ref(self, embeds1, embeds2, mode, embeds3=None):
        embeds = [embeds1, embeds2]
        if embeds3 is not None and not (
            isinstance(embeds3, (list, tuple)) and len(embeds3) == 0
        ):
            embeds.append(embeds3)
        return _xla_forward(self.pre_mats[mode], self.post_mats[mode], embeds)


if __name__ == "__main__":
    key = jax.random.PRNGKey(0)

    mode_dims = {"person": 32, "paper": 32}
    expand_dims = {"person": 64, "paper": 64}
    mode = "person"
    D = mode_dims[mode]

    k_params, k1, k2, k3, k4, k5 = jax.random.split(key, 6)
    dec = SetIntersectionJAX(mode_dims, expand_dims, k_params)

    # Deliberate tolerance: the kernel uses bf16 MXU operands with f32
    # accumulation, compared against an f32 HIGHEST-precision XLA reference.
    TOL = dict(rtol=3e-2, atol=3e-2)

    # --- Pallas path, misaligned batch (not a multiple of 128): exercises the
    # masked edge tile with no wrapper pad/slice. ---
    batch = 300
    e1 = jax.random.normal(k1, (D, batch), dtype=jnp.float32)
    e2 = jax.random.normal(k2, (D, batch), dtype=jnp.float32)
    e3 = jax.random.normal(k3, (D, batch), dtype=jnp.float32)

    out2 = jax.block_until_ready(dec.forward(e1, e2, mode))
    ref2 = dec.forward_ref(e1, e2, mode)
    np.testing.assert_allclose(np.asarray(out2), np.asarray(ref2), **TOL)

    out3 = jax.block_until_ready(dec.forward(e1, e2, mode, embeds3=e3))
    ref3 = dec.forward_ref(e1, e2, mode, embeds3=e3)
    np.testing.assert_allclose(np.asarray(out3), np.asarray(ref3), **TOL)

    # --- Multi-tile grid (tile_batch=128 -> 3 batch tiles, last one partial):
    # checks the VMEM-resident pre/post weights survive across grid steps. ---
    out3_mt = jax.block_until_ready(
        dec.forward(e1, e2, mode, embeds3=e3, tile_batch=128))
    np.testing.assert_allclose(np.asarray(out3_mt), np.asarray(ref3), **TOL)

    # --- Tiny batch (8 columns): XLA fallback path, exact to the reference. ---
    small = 8
    s1 = jax.random.normal(k4, (D, small), dtype=jnp.float32)
    s2 = jax.random.normal(k5, (D, small), dtype=jnp.float32)
    out_small = jax.block_until_ready(dec.forward(s1, s2, mode))
    ref_small = dec.forward_ref(s1, s2, mode)
    np.testing.assert_allclose(np.asarray(out_small), np.asarray(ref_small),
                               rtol=1e-5, atol=1e-5)

    print("KERNEL_OK")
</pallas_src>

<mosaic_0001>
module attributes {stable_mosaic.version = 11 : i64} {
  func.func @_set_intersection_kernel2(%arg0: i32, %arg1: memref<64x32xf32, #tpu.memory_space<vmem>>, %arg2: memref<32x64xf32, #tpu.memory_space<vmem>>, %arg3: memref<32x384xf32, #tpu.memory_space<vmem>>, %arg4: memref<32x384xf32, #tpu.memory_space<vmem>>, %arg5: memref<32x384xf32, #tpu.memory_space<vmem>>) attributes {dimension_semantics = [#tpu.dimension_semantics<parallel>], iteration_bounds = array<i64: 1>, scalar_prefetch = 0 : i64, scratch_operands = 0 : i64, tpu.core_type = #tpu.core_type<tc>, window_params = [{pipeline_mode = #tpu.pipeline_mode<synchronous>, transform_indices = @transform_0, window_bounds = array<i64: 64, 32>}, {pipeline_mode = #tpu.pipeline_mode<synchronous>, transform_indices = @transform_1, window_bounds = array<i64: 32, 64>}, {transform_indices = @transform_2, window_bounds = array<i64: 32, 384>}, {transform_indices = @transform_3, window_bounds = array<i64: 32, 384>}, {transform_indices = @transform_4, window_bounds = array<i64: 32, 384>}]} {
    %c0 = arith.constant 0 : index
    %c0_0 = arith.constant 0 : index
    %0 = vector.load %arg1[%c0, %c0_0] : memref<64x32xf32, #tpu.memory_space<vmem>>, vector<64x32xf32>
    %c0_1 = arith.constant 0 : index
    %c0_2 = arith.constant 0 : index
    %1 = vector.load %arg3[%c0_1, %c0_2] : memref<32x384xf32, #tpu.memory_space<vmem>>, vector<32x384xf32>
    %2 = arith.truncf %0 : vector<64x32xf32> to vector<64x32xbf16>
    %3 = arith.truncf %1 : vector<32x384xf32> to vector<32x384xbf16>
    %cst = arith.constant dense<0.000000e+00> : vector<64x384xf32>
    %4 = tpu.matmul %2, %3, %cst {dimension_numbers = #tpu.dot_dimension_numbers<[1], [0], [0], [1], [0, 0, 1, 1], [], []>} : vector<64x32xbf16>, vector<32x384xbf16>, vector<64x384xf32> -> vector<64x384xf32>
    %cst_3 = arith.constant 0.000000e+00 : f32
    %5 = vector.broadcast %cst_3 : f32 to vector<64x384xf32>
    %6 = arith.maximumf %4, %5 : vector<64x384xf32>
    %c0_4 = arith.constant 0 : index
    %c0_5 = arith.constant 0 : index
    %7 = vector.load %arg4[%c0_4, %c0_5] : memref<32x384xf32, #tpu.memory_space<vmem>>, vector<32x384xf32>
    %8 = arith.truncf %0 : vector<64x32xf32> to vector<64x32xbf16>
    %9 = arith.truncf %7 : vector<32x384xf32> to vector<32x384xbf16>
    %cst_6 = arith.constant dense<0.000000e+00> : vector<64x384xf32>
    %10 = tpu.matmul %8, %9, %cst_6 {dimension_numbers = #tpu.dot_dimension_numbers<[1], [0], [0], [1], [0, 0, 1, 1], [], []>} : vector<64x32xbf16>, vector<32x384xbf16>, vector<64x384xf32> -> vector<64x384xf32>
    %cst_7 = arith.constant 0.000000e+00 : f32
    %11 = vector.broadcast %cst_7 : f32 to vector<64x384xf32>
    %12 = arith.maximumf %10, %11 : vector<64x384xf32>
    %13 = arith.minimumf %6, %12 : vector<64x384xf32>
    %c0_8 = arith.constant 0 : index
    %c0_9 = arith.constant 0 : index
    %14 = vector.load %arg2[%c0_8, %c0_9] : memref<32x64xf32, #tpu.memory_space<vmem>>, vector<32x64xf32>
    %15 = arith.truncf %14 : vector<32x64xf32> to vector<32x64xbf16>
    %16 = arith.truncf %13 : vector<64x384xf32> to vector<64x384xbf16>
    %cst_10 = arith.constant dense<0.000000e+00> : vector<32x384xf32>
    %17 = tpu.matmul %15, %16, %cst_10 {dimension_numbers = #tpu.dot_dimension_numbers<[1], [0], [0], [1], [0, 0, 1, 1], [], []>} : vector<32x64xbf16>, vector<64x384xbf16>, vector<32x384xf32> -> vector<32x384xf32>
    %c0_11 = arith.constant 0 : index
    %c0_12 = arith.constant 0 : index
    %18 = vector.load %arg5[%c0_11, %c0_12] : memref<32x384xf32, #tpu.memory_space<vmem>>, vector<32x384xf32>
    tpu.vector_store %arg5[%c0_11, %c0_12], %17 {strides = array<i32>} : memref<32x384xf32, #tpu.memory_space<vmem>>, vector<32x384xf32>,
    return
  }
  func.func @transform_0(%arg0: i32) -> (i32, i32) {
    %c0_i32 = arith.constant 0 : i32
    %c0_i32_0 = arith.constant 0 : i32
    %c0_i32_1 = arith.constant 0 : i32
    return %c0_i32, %c0_i32_0 : i32, i32
  }
  func.func @transform_1(%arg0: i32) -> (i32, i32) {
    %c0_i32 = arith.constant 0 : i32
    %c0_i32_0 = arith.constant 0 : i32
    %c0_i32_1 = arith.constant 0 : i32
    return %c0_i32, %c0_i32_0 : i32, i32
  }
  func.func @transform_2(%arg0: i32) -> (i32, i32) {
    %c0_i32 = arith.constant 0 : i32
    %c0_i32_0 = arith.constant 0 : i32
    return %c0_i32, %arg0 : i32, i32
  }
  func.func @transform_3(%arg0: i32) -> (i32, i32) {
    %c0_i32 = arith.constant 0 : i32
    %c0_i32_0 = arith.constant 0 : i32
    return %c0_i32, %arg0 : i32, i32
  }
  func.func @transform_4(%arg0: i32) -> (i32, i32) {
    %c0_i32 = arith.constant 0 : i32
    %c0_i32_0 = arith.constant 0 : i32
    return %c0_i32, %arg0 : i32, i32
  }
}

</mosaic_0001>

<bundles_post_ra>
// kernel: tpu_custom_call.1
= control target key start
LH: loop header
LB: loop body
LE: loop exit
PB: predicated region body
PF: predicated region fallthrough
CT: control target
= control target key end

     0   :  { %9 = vsyncpa [#allocation3], 0  ;;  %s1017_s0 = inlined_call_operand.vmem [shape: f32[64,32], index: 0, kind: input, shape index: {}]   ;;  %s1018_s1 = inlined_call_operand.hbm [shape: f32[32,64], index: 1, kind: input, shape index: {}]   ;;  %s1019_s2 = inlined_call_operand.vmem [shape: f32[32,300], index: 2, kind: input, shape index: {}]   ;;  %s1020_s3 = inlined_call_operand.hbm [shape: f32[32,300], index: 3, kind: input, shape index: {}]   ;;  %s1021_s4 = inlined_call_operand.hbm [shape: f32[32,300], index: 4, kind: output, shape index: {}]  }
   0x1   :  { %10 = vsyncpa [#allocation6], 0 }
   0x2   :  { %11 = vsyncpa [#allocation4], 0  ;;  %s761_s15 = smov [#allocation2]  }
   0x3   :  { %s19_s16 = sshll.u32 %s761_s15, 4  ;;  %s20_s16 = int_to_ptr.vmem [resolvable:$true] %s19_s16 }
   0x4   :  { %s703_s17 = scalar_lea.vmem %s20_s16, 512  ;;  %p708_p1 = scmp.lt.s32.totalorder %s20_s16, %s20_s16 }
   0x5   :  { %p704_p0 = scmp.ne.s32.totalorder %s20_s16, %s703_s17  ;;  %p709_p2 = scmp.lt.s32.totalorder %s703_s17, %s703_s17 }
   0x7   :  { %p710_p3 = por %p709_p2, %p708_p1 }
   0x9   :  { %p711_p4 = pnand %p710_p3, %p704_p0 }
   0xb   :  { %714 = shalt.err (!%p711_p4)
}
   0xc   :  { %s762_s18 = smov 128   ;;  %s763_s19 = smov 8  }
   0xd   :  { %25 = dma.hbm_to_vmem [thread:$0]  %s1018_s1, 512, %s20_s16, [#allocation3], %s762_s18, %s762_s18, %s763_s19  }
   0xe   :  { %s764_s22 = smov [#allocation5]  }
   0xf   :  { %s33_s23 = sshll.u32 %s764_s22, 4  ;;  %s34_s23 = int_to_ptr.vmem [resolvable:$true] %s33_s23 }
  0x10   :  { %s723_s24 = scalar_lea.vmem %s34_s23, 1536  ;;  %p728_p6 = scmp.lt.s32.totalorder %s34_s23, %s34_s23 }
  0x11   :  { %p724_p5 = scmp.ne.s32.totalorder %s34_s23, %s723_s24  ;;  %p729_p7 = scmp.lt.s32.totalorder %s723_s24, %s723_s24 }
  0x13   :  { %p730_p8 = por %p729_p7, %p728_p6 }
  0x15   :  { %p731_p9 = pnand %p730_p8, %p724_p5 }
  0x17   :  { %734 = shalt.err (!%p731_p9)
}
  0x18   :  { %s765_s25 = smov 384   ;;  %s766_s26 = smov 24  }
  0x19   :  { %39 = dma.hbm_to_vmem [thread:$0]  %s1020_s3, 1536, %s34_s23, [#allocation6], %s765_s25, %s765_s25, %s766_s26  }
  0x1a   :  { %755 = dma.done.wait [#allocation3], 512  }
  0x1b   :  { %756 = vsyncadd [#allocation3], 4294966784 }
  0x1c   :  { %757 = dma.done.wait [#allocation6], 1536  }
  0x1d   :  { %758 = vsyncadd [#allocation6], 4294965760  ;;  %v1022_v0 = vmov 0   ;;  %v62_v1 = vld [vmem:[%s1019_s2 + $0x38] sm:$0xff]  ;;  %v65_v2 = vld [vmem:[%s1019_s2 + $0x50] sm:$0xff]  ;;  %vm77_vm0 = vcmask 261120  }
  0x1e   :  { %122 = vmatprep.mubr.bf16.mxu0 %v1022_v0  ;;  %v63_v3 = vld [vmem:[%s1019_s2 + $0x40] sm:$0xff]  ;;  %v75_v4 = vpack.c.bf16 %v65_v2, %v62_v1  ;;  %v66_v5 = vld [vmem:[%s1019_s2 + $0x58] sm:$0xff]  ;;  %v61_v6 = vld [vmem:[%s1019_s2 + $0x30] sm:$0xff]  ;;  %vm474_vm1 = vcmask 523264  }
  0x1f   :  { %v64_v7 = vld [vmem:[%s1019_s2 + $0x48] sm:$0xff]  ;;  %v76_v8 = vpack.c.bf16 %v66_v5, %v63_v3  ;;  %v59_v11 = vld [vmem:[%s1019_s2 + $0x20] sm:$0xff]  ;;  %v57_v12 = vld [vmem:[%s1019_s2 + $0x10] sm:$0xff] }
  0x20   :  { %v74_v9 = vpack.c.bf16 %v64_v7, %v61_v6  ;;  %v56_v10 = vld [vmem:[%s1019_s2 + $0x8] sm:$0xff]  ;;  %102 = vmatprep.subr.bf16.mxu0 %v75_v4  ;;  %v55_v15 = vld [vmem:[%s1019_s2] sm:$0xff]  ;;  %v58_v16 = vld [vmem:[%s1019_s2 + $0x18] sm:$0xff] }
  0x21   :  { %v72_v13 = vpack.c.bf16 %v59_v11, %v56_v10  ;;  %v60_v14 = vld [vmem:[%s1019_s2 + $0x28] sm:$0xff]  ;;  %651 = vmatprep.subr.bf16.mxu1 %v76_v8  ;;  %v71_v18 = vpack.c.bf16 %v58_v16, %v55_v15  ;;  %v47_v19 = vld [vmem:[%s1017_s0] sm:$0xff]  ;;  %v49_v21 = vld [vmem:[%s1017_s0 + $0x10] sm:$0xff] }
  0x22   :  { %103 = vmatpush1.bf16.msra.mxu0 %v74_v9  ;;  %v73_v17 = vpack.c.bf16 %v60_v14, %v57_v12  ;;  %v48_v20 = vld [vmem:[%s1017_s0 + $0x8] sm:$0xff]  ;;  %652 = vmatpush3.bf16.msra.mxu1 %v76_v8  ;;  %v50_v23 = vld [vmem:[%s1017_s0 + $0x18] sm:$0xff]  ;;  %v262_v25 = vld [vmem:[#allocation5 + $0x50] sm:$0xff] }
  0x23   :  { %104 = vmatprep.subr.bf16.mxu0 %v72_v13  ;;  %v67_v22 = vpack.c.bf16 %v48_v20, %v47_v19  ;;  %v259_v24 = vld [vmem:[#allocation5 + $0x38] sm:$0xff]  ;;  %v51_v27 = vld [vmem:[%s1017_s0 + $0x20] sm:$0xff]  ;;  %v52_v28 = vld [vmem:[%s1017_s0 + $0x28] sm:$0xff]  ;;  %v68_v31 = vpack.c.bf16 %v50_v23, %v49_v21 }
  0x24   :  { %653 = vmatprep.subr.bf16.mxu1 %v73_v17  ;;  %v268_v26 = vpack.c.bf16 %v262_v25, %v259_v24  ;;  %v258_v29 = vld [vmem:[#allocation5 + $0x30] sm:$0xff]  ;;  %v261_v30 = vld [vmem:[#allocation5 + $0x48] sm:$0xff]  ;;  %v256_v33 = vld [vmem:[#allocation5 + $0x20] sm:$0xff]  ;;  %v69_v34 = vpack.c.bf16 %v52_v28, %v51_v27 }
  0x25   :  { %655 = vmatprep.mubr.msk.bf16.mxu1 %vm77_vm0, %v67_v22  ;;  %v253_v32 = vld [vmem:[#allocation5 + $0x8] sm:$0xff]  ;;  %v267_v35 = vpack.c.bf16 %v261_v30, %v258_v29  ;;  %v252_v36 = vld [vmem:[#allocation5] sm:$0xff]  ;;  %v263_v38 = vld [vmem:[#allocation5 + $0x58] sm:$0xff] }
  0x26   :  { %105 = vmatpush1.bf16.msra.mxu0 %v71_v18  ;;  %654 = vmatpush3.bf16.msra.mxu1 %v73_v17  ;;  %v260_v37 = vld [vmem:[#allocation5 + $0x40] sm:$0xff]  ;;  %v265_v39 = vpack.c.bf16 %v256_v33, %v253_v32  ;;  %v255_v40 = vld [vmem:[#allocation5 + $0x18] sm:$0xff]  ;;  %v254_v42 = vld [vmem:[#allocation5 + $0x10] sm:$0xff] }
  0x27   :  { %282 = vmatprep.subr.bf16.mxu1 %v268_v26  ;;  %v269_v41 = vpack.c.bf16 %v263_v38, %v260_v37  ;;  %v257_v43 = vld [vmem:[#allocation5 + $0x28] sm:$0xff]  ;;  %v53_v45 = vld [vmem:[%s1017_s0 + $0x30] sm:$0xff]  ;;  %v54_v46 = vld [vmem:[%s1017_s0 + $0x38] sm:$0xff]  ;;  %v264_v47 = vpack.c.bf16 %v255_v40, %v252_v36  ;;  %s768_s0 = smov [#allocation7]  }
  0x28   :  { %v266_v44 = vpack.c.bf16 %v257_v43, %v254_v42  ;;  %v70_v48 = vpack.c.bf16 %v54_v46, %v53_v45  ;;  %v456_v49 = vld [vmem:[#allocation2] sm:$0xff]  ;;  %v457_v50 = vld [vmem:[#allocation2 + $0x8] sm:$0xff]  ;;  %s600_s14 = sshll.u32 %s768_s0, 4  ;;  %s601_s14 = int_to_ptr.vmem [resolvable:$true] %s600_s14 }
  0x29   :  { %613 = vmatmul.mubr.msk.bf16.vlgmr.msra.gmra.mxu0 %vm77_vm0, %v67_v22  ;;  %656 = vmatmul.mubr.msk.bf16.vlgmr.msra.gmra.mxu1 %vm77_vm0, %v68_v31  ;;  %v888_v51 = vpack.c.bf16 %v457_v50, %v456_v49  ;;  %s735_s15 = scalar_lea.vmem %s601_s14, 1536  ;;  %p740_p11 = scmp.lt.s32.totalorder %s601_s14, %s601_s14 }
  0x2a   :  { %132 = vmatprep.mubr.bf16.mxu0 %v1022_v0  ;;  %659 = vmatprep.mubr.msk.bf16.mxu1 %vm77_vm0, %v69_v34  ;;  %p736_p10 = scmp.ne.s32.totalorder %s601_s14, %s735_s15  ;;  %p741_p12 = scmp.lt.s32.totalorder %s735_s15, %s735_s15 }
  0x2b   :  { %283 = vmatpush1.bf16.msra.mxu1 %v267_v35  ;;  %663 = vmatprep.subr.bf16.mxu0 %v269_v41 }
  0x2c   :  { %284 = vmatprep.subr.bf16.mxu1 %v265_v39  ;;  %664 = vmatpush3.bf16.msra.mxu0 %v269_v41  ;;  %p742_p13 = por %p741_p12, %p740_p11 }
  0x2d   :  { %665 = vmatprep.subr.bf16.mxu0 %v266_v44 }
  0x2e   :  { %p743_p0 = pnand %p742_p13, %p736_p10 }
  0x2f   :  { %285 = vmatpush1.bf16.msra.mxu1 %v264_v47 }
  0x30   :  { %666 = vmatpush3.bf16.msra.mxu0 %v266_v44 }
  0x31   :  { %614 = vmatmul.mubr.msk.bf16.gmra.mxu0 %vm77_vm0, %v68_v31  ;;  %660 = vmatmul.mubr.msk.bf16.gmra.mxu1 %vm77_vm0, %v70_v48 }
  0x32   :  { %142 = vmatprep.mubr.bf16.mxu0 %v1022_v0  ;;  %302 = vmatprep.mubr.bf16.mxu1 %v1022_v0 }
  0x39   :  { %615 = vmatmul.mubr.msk.bf16.gmra.mxu0 %vm77_vm0, %v69_v34  ;;  %621 = vmatmul.mubr.msk.bf16.vlgmr.msra.gmra.mxu1 %vm77_vm0, %v67_v22 }
  0x3a   :  { %152 = vmatprep.mubr.bf16.mxu0 %v1022_v0  ;;  %312 = vmatprep.mubr.bf16.mxu1 %v1022_v0 }
  0x41   :  { %616 = vmatmul.mubr.msk.bf16.gmra.mxu0 %vm77_vm0, %v70_v48  ;;  %622 = vmatmul.mubr.msk.bf16.gmra.mxu1 %vm77_vm0, %v68_v31 }
  0x42   :  { %667 = vmatprep.mubr.msk.bf16.mxu0 %vm77_vm0, %v67_v22  ;;  %322 = vmatprep.mubr.bf16.mxu1 %v1022_v0 }
  0x49   :  { %668 = vmatmul.mubr.msk.bf16.vlgmr.msra.gmra.mxu0 %vm77_vm0, %v68_v31  ;;  %623 = vmatmul.mubr.msk.bf16.gmra.mxu1 %vm77_vm0, %v69_v34 }
  0x4a   :  { %671 = vmatprep.mubr.msk.bf16.mxu0 %vm77_vm0, %v69_v34  ;;  %332 = vmatprep.mubr.bf16.mxu1 %v1022_v0 }
  0x51   :  { %672 = vmatmul.mubr.msk.bf16.gmra.mxu0 %vm77_vm0, %v70_v48  ;;  %624 = vmatmul.mubr.msk.bf16.gmra.mxu1 %vm77_vm0, %v70_v48 }
  0x52   :  { %513 = vmatprep.mubr.bf16.mxu0 %v1022_v0  ;;  %683 = vmatprep.mubr.msk.bf16.mxu1 %vm474_vm1, %v888_v51 }
  0xe9   :  { %v892_v52 = vpop.f32.mrf.mxu0  ;;  %v894_v53 = vpop.f32.mrf.mxu1 }
  0xea   :  { %v236_v29 = vmax.f32 %v894_v53, 0.0 }
  0xeb   :  { %v896_v54 = vpop.f32.mrf.mxu0  ;;  %v898_v55 = vpop.f32.mrf.mxu1 }
  0xed   :  { %v900_v56 = vpop.f32.mrf.mxu0  ;;  %v902_v57 = vpop.f32.mrf.mxu1 }
  0xee   :  { %v239_v32 = vmax.f32 %v902_v57, 0.0 }
  0xef   :  { %v904_v58 = vpop.f32.mrf.mxu0  ;;  %v906_v59 = vpop.f32.mrf.mxu1 }
  0xf1   :  { %v908_v60 = vpop.f32.mrf.mxu0  ;;  %v910_v61 = vpop.f32.mrf.mxu1 }
  0xf2   :  { %v248_v34 = vmax.f32 %v910_v61, 0.0 }
  0xf3   :  { %v912_v62 = vpop.f32.mrf.mxu0  ;;  %v914_v63 = vpop.f32.mrf.mxu1 }
  0xf4   :  { %v242_v37 = vmax.f32 %v914_v63, 0.0 }
  0xf5   :  { %v916_v1 = vpop.f32.mrf.mxu0  ;;  %v918_v2 = vpop.f32.mrf.mxu1 }
  0xf6   :  { %v251_v38 = vmax.f32 %v918_v2, 0.0 }
  0xf7   :  { %v920_v3 = vpop.f32.mrf.mxu0  ;;  %v922_v4 = vpop.f32.mrf.mxu1 }
  0xf8   :  { %v238_v39 = vmax.f32 %v920_v3, 0.0  ;;  %v245_v40 = vmax.f32 %v922_v4, 0.0 }
  0xf9   :  { %v924_v5 = vpop.f32.mrf.mxu0  ;;  %v926_v6 = vpop.f32.mrf.mxu1 }
  0xfa   :  { %v240_v42 = vmax.f32 %v924_v5, 0.0 }
  0xfb   :  { %v928_v7 = vpop.f32.mrf.mxu0  ;;  %v930_v8 = vpop.f32.mrf.mxu1 }
  0xfc   :  { %v241_v43 = vmax.f32 %v928_v7, 0.0 }
  0xfd   :  { %v932_v9 = vpop.f32.mrf.mxu0  ;;  %v934_v10 = vpop.f32.mrf.mxu1 }
  0xfe   :  { %v243_v44 = vmax.f32 %v932_v9, 0.0 }
  0xff   :  { %v936_v11 = vpop.f32.mrf.mxu0  ;;  %v938_v12 = vpop.f32.mrf.mxu1 }
 0x100   :  { %v244_v47 = vmax.f32 %v936_v11, 0.0 }
 0x101   :  { %v940_v13 = vpop.f32.mrf.mxu0  ;;  %v942_v14 = vpop.f32.mrf.mxu1 }
 0x102   :  { %v246_v48 = vmax.f32 %v940_v13, 0.0 }
 0x103   :  { %v944_v15 = vpop.f32.mrf.mxu0  ;;  %v946_v16 = vpop.f32.mrf.mxu1 }
 0x104   :  { %v247_v49 = vmax.f32 %v944_v15, 0.0 }
 0x105   :  { %v158_v17 = vpop.f32.mrf.mxu0  ;;  %v948_v18 = vpop.f32.mrf.mxu1 }
 0x106   :  { %v249_v50 = vmax.f32 %v158_v17, 0.0 }
 0x107   :  { %v160_v19 = vpop.f32.mrf.mxu0  ;;  %v950_v20 = vpop.f32.mrf.mxu1 }
 0x108   :  { %v250_v57 = vmax.f32 %v160_v19, 0.0  ;;  %v418_v61 = vmax.f32 %v950_v20, 0.0 }
 0x109   :  { %v952_v21 = vpop.f32.mrf.mxu0  ;;  %v954_v22 = vpop.f32.mrf.mxu1 }
 0x10a   :  { %v416_v15 = vmax.f32 %v952_v21, 0.0 }
 0x10b   :  { %v956_v23 = vpop.f32.mrf.mxu0  ;;  %v958_v24 = vpop.f32.mrf.mxu1 }
 0x10c   :  { %v421_v17 = vmax.f32 %v958_v24, 0.0  ;;  %v415_v24 = vmax.f32 %v946_v16, 0.0  ;;  %v414_v16 = vmax.f32 %v942_v14, 0.0 }
 0x10d   :  { %v670_v25 = vpop.f32.mrf.mxu0  ;;  %v960_v26 = vpop.f32.mrf.mxu1 }
 0x10e   :  { %v419_v4 = vmax.f32 %v670_v25, 0.0  ;;  %v423_v19 = vmax.f32 %v960_v26, 0.0  ;;  %v417_v26 = vmax.f32 %v948_v18, 0.0  ;;  %v1023_v18 = vmax.f32 %v906_v59, 0.0 }
 0x10f   :  { %v962_v27 = vpop.f32.mrf.mxu0  ;;  %v330_v28 = vpop.f32.mrf.mxu1 }
 0x110   :  { %v424_v5 = vmax.f32 %v330_v28, 0.0  ;;  %v420_v28 = vmax.f32 %v954_v22, 0.0  ;;  %v447_v22 = vmin.f32 %v243_v44, %v423_v19  ;;  %v409_v44 = vmax.f32 %v930_v8, 0.0 }
 0x111   :  { %v673_v31 = vpop.f32.mrf.mxu0  ;;  %v334_v36 = vpop.f32.mrf.mxu1  ;;  %v408_v8 = vmax.f32 %v926_v6, 0.0  ;;  %v1026_v6 = vmov 0  }
 0x112   :  { %v428_v45 = vmax.f32 %v673_v31, 0.0  ;;  %v426_v0 = vmax.f32 %v334_v36, 0.0 }
 0x113   :  { %v393_v41 = vpop.f32.mrf.mxu0  ;;  %v336_v46 = vpop.f32.mrf.mxu1 }
 0x114   :  { %v422_v63 = vmax.f32 %v393_v41, 0.0  ;;  %v427_v7 = vmax.f32 %v336_v46, 0.0  ;;  %v452_v30 = vmin.f32 %v248_v34, %v428_v45  ;;  %v448_v46 = vmin.f32 %v244_v47, %v424_v5 }
 0x115   :  { %v674_v53 = vpop.f32.mrf.mxu0  ;;  %v338_v2 = vpop.f32.mrf.mxu1  ;;  %v443_v34 = vmin.f32 %v239_v32, %v419_v4  ;;  %v450_v45 = vmin.f32 %v246_v48, %v426_v0  ;;  %v237_v32 = vmax.f32 %v916_v1, 0.0  ;;  %v442_v0 = vmin.f32 %v238_v39, %v418_v61  ;;  %v459_v4 = vld [vmem:[#allocation2 + $0x18] sm:$0xff] }
 0x116   :  { %v431_v3 = vmax.f32 %v674_v53, 0.0  ;;  %v429_v9 = vmax.f32 %v338_v2, 0.0  ;;  %v446_v41 = vmin.f32 %v242_v37, %v422_v63  ;;  %v451_v2 = vmin.f32 %v247_v49, %v427_v7 }
 0x117   :  { %v396_v31 = vpop.f32.mrf.mxu0  ;;  %v340_v35 = vpop.f32.mrf.mxu1  ;;  %v444_v49 = vmin.f32 %v240_v42, %v420_v28  ;;  %v1024_v1 = vmax.f32 %v912_v62, 0.0  ;;  %v411_v39 = vmax.f32 %v934_v10, 0.0  ;;  %v441_v14 = vmin.f32 %v237_v32, %v417_v26  ;;  %v458_v10 = vld [vmem:[#allocation2 + $0x10] sm:$0xff] }
 0x118   :  { %v455_v11 = vmin.f32 %v251_v38, %v431_v3  ;;  %v425_v13 = vmax.f32 %v396_v31, 0.0  ;;  %v430_v20 = vmax.f32 %v340_v35, 0.0  ;;  %v453_v33 = vmin.f32 %v249_v50, %v429_v9 }
 0x119   :  { %v413_v38 = vmax.f32 %v962_v27, 0.0  ;;  %v445_v35 = vmin.f32 %v241_v43, %v421_v17  ;;  %v412_v27 = vmax.f32 %v938_v12, 0.0  ;;  %v439_v12 = vmin.f32 %v1024_v1, %v415_v24 }
 0x11a   :  { %v449_v53 = vmin.f32 %v245_v40, %v425_v13  ;;  %v473_v25 = vpack.c.bf16 %v455_v11, %v452_v30  ;;  %v454_v36 = vmin.f32 %v250_v57, %v430_v20  ;;  %v440_v40 = vmin.f32 %v236_v29, %v416_v15 }
 0x11b   :  { %v410_v30 = vmax.f32 %v956_v23, 0.0  ;;  %v471_v47 = vpack.c.bf16 %v453_v33, %v450_v45  ;;  %v469_v48 = vpack.c.bf16 %v448_v46, %v445_v35  ;;  %v437_v43 = vmin.f32 %v1023_v18, %v413_v38 }
 0x11c   :  { %675 = vmatprep.subr.bf16.mxu1 %v473_v25  ;;  %v470_v21 = vpack.c.bf16 %v449_v53, %v446_v41  ;;  %v472_v37 = vpack.c.bf16 %v454_v36, %v451_v2  ;;  %v467_v29 = vpack.c.bf16 %v443_v34, %v440_v40  ;;  %v232_v23 = vmax.f32 %v904_v58, 0.0 }
 0x11d   :  { %676 = vmatpush3.bf16.msra.mxu1 %v473_v25  ;;  %v234_v33 = vmax.f32 %v908_v60, 0.0  ;;  %v1025_v42 = vmax.f32 %v898_v55, 0.0  ;;  %v468_v50 = vpack.c.bf16 %v447_v22, %v444_v49  ;;  %v229_v57 = vmax.f32 %v896_v54, 0.0 }
 0x11e   :  { %677 = vmatprep.subr.bf16.mxu1 %v470_v21  ;;  %489 = vmatprep.subr.bf16.mxu0 %v472_v37  ;;  %v436_v58 = vmin.f32 %v232_v23, %v412_v27  ;;  %v466_v61 = vpack.c.bf16 %v442_v0, %v439_v12  ;;  %v231_v60 = vmax.f32 %v900_v56, 0.0  ;;  %v228_v55 = vmax.f32 %v892_v52, 0.0 }
 0x11f   :  { %490 = vmatpush1.bf16.msra.mxu0 %v471_v47  ;;  %v434_v59 = vmin.f32 %v1025_v42, %v410_v30  ;;  %v438_v62 = vmin.f32 %v234_v33, %v414_v16  ;;  %v433_v3 = vmin.f32 %v229_v57, %v409_v44  ;;  %v461_v31 = vpack.c.bf16 %v459_v4, %v458_v10 }
 0x120   :  { %491 = vmatprep.subr.bf16.mxu0 %v469_v48  ;;  %v435_v5 = vmin.f32 %v231_v60, %v411_v39  ;;  %v432_v9 = vmin.f32 %v228_v55, %v408_v8 }
 0x121   :  { %678 = vmatpush3.bf16.msra.mxu1 %v470_v21  ;;  %v464_v63 = vpack.c.bf16 %v437_v43, %v434_v59  ;;  %v465_v7 = vpack.c.bf16 %v441_v14, %v438_v62  ;;  %v463_v54 = vpack.c.bf16 %v436_v58, %v433_v3 }
 0x122   :  { %679 = vmatprep.subr.bf16.mxu1 %v467_v29  ;;  %v462_v56 = vpack.c.bf16 %v435_v5, %v432_v9 }
 0x123   :  { %492 = vmatpush1.bf16.msra.mxu0 %v468_v50 }
 0x124   :  { %493 = vmatprep.subr.bf16.mxu0 %v466_v61 }
 0x125   :  { %680 = vmatpush3.bf16.msra.mxu1 %v467_v29 }
 0x126   :  { %681 = vmatprep.subr.bf16.mxu1 %v464_v63 }
 0x127   :  { %494 = vmatpush1.bf16.msra.mxu0 %v465_v7 }
 0x128   :  { %495 = vmatprep.subr.bf16.mxu0 %v463_v54 }
 0x129   :  { %682 = vmatpush3.bf16.msra.mxu1 %v464_v63 }
 0x12b   :  { %496 = vmatpush1.bf16.msra.mxu0 %v462_v56 }
 0x12c   :  { %684 = vmatmul.mubr.msk.bf16.vlgmr.msra.gmra.mxu1 %vm474_vm1, %v461_v31 }
 0x12e   :  { %629 = vmatmul.mubr.msk.bf16.vlgmr.msra.gmra.mxu0 %vm474_vm1, %v888_v51 }
 0x12f   :  { %523 = vmatprep.mubr.bf16.mxu0 %v1026_v6 }
 0x136   :  { %630 = vmatmul.mubr.msk.bf16.gmra.mxu0 %vm474_vm1, %v461_v31 }
 0x1ec   :  { %v685_v52 = vpop.f32.mrf.mxu1 }
 0x1ed   :  { %591 = vst [vmem:[#allocation7 + $0x40] sm:$0xff] %v685_v52 }
 0x1ee   :  { %v568_v11 = vpop.f32.mrf.mxu1  ;;  %v515_v13 = vpop.f32.mrf.mxu0 }
 0x1ef   :  { %585 = vst [vmem:[#allocation7 + $0x10] sm:$0xff] %v568_v11  ;;  %583 = vst [vmem:[#allocation7] sm:$0xff] %v515_v13 }
 0x1f0   :  { %v686_v15 = vpop.f32.mrf.mxu1  ;;  %v517_v17 = vpop.f32.mrf.mxu0 }
 0x1f1   :  { %594 = vst [vmem:[#allocation7 + $0x58] sm:$0xff] %v686_v15  ;;  %584 = vst [vmem:[#allocation7 + $0x8] sm:$0xff] %v517_v17 }
 0x1f2   :  { %v571_v19 = vpop.f32.mrf.mxu1  ;;  %v519_v20 = vpop.f32.mrf.mxu0 }
 0x1f3   :  { %588 = vst [vmem:[#allocation7 + $0x28] sm:$0xff] %v571_v19  ;;  %586 = vst [vmem:[#allocation7 + $0x18] sm:$0xff] %v519_v20 }
 0x1f4   :  { %v521_v41 = vpop.f32.mrf.mxu0 }
 0x1f5   :  { %587 = vst [vmem:[#allocation7 + $0x20] sm:$0xff] %v521_v41 }
 0x1f6   :  { %v525_v51 = vpop.f32.mrf.mxu0 }
 0x1f7   :  { %589 = vst [vmem:[#allocation7 + $0x30] sm:$0xff] %v525_v51 }
 0x1f8   :  { %v527_v53 = vpop.f32.mrf.mxu0 }
 0x1f9   :  { %590 = vst [vmem:[#allocation7 + $0x38] sm:$0xff] %v527_v53 }
 0x1fa   :  { %v529_v25 = vpop.f32.mrf.mxu0 }
 0x1fb   :  { %592 = vst [vmem:[#allocation7 + $0x48] sm:$0xff] %v529_v25 }
 0x1fc   :  { %v531_v28 = vpop.f32.mrf.mxu0 }
 0x1fd   :  { %593 = vst [vmem:[#allocation7 + $0x50] sm:$0xff] %v531_v28 }
 0x1fe   :  { %746 = shalt.err (!%p743_p0)
}
 0x1ff   :  { %606 = dma.vmem_to_hbm [thread:$0]  %s601_s14, 1536, %s1021_s4, [#allocation4], %s765_s25, %s765_s25, %s766_s26  }
 0x200   :  { %759 = dma.done.wait [#allocation4], 1536  }
 0x201   :  { %760 = vsyncadd [#allocation4], 4294965760 }
 0x202   :  { %610 = vsyncpa [#allocation3], 1 }
 0x203   :  { %611 = vsyncpa [#allocation6], 1 }
 0x204   :  { %612 = vsyncpa [#allocation4], 1 }

</bundles_post_ra>
